<compile_context>
chip_gen: v7x
topology: tpu7x:2x2x1
jax: 0.10.0
libtpu: 0.0.40
codegen_flags: <defaults>
</compile_context>

<pallas_src>
import functools

import jax
import jax.numpy as jnp
from jax.experimental import pallas as pl
from jax.experimental.pallas import tpu as pltpu

N_STATES = 3      # pendulum observation dim
HIDDEN = 128
BOUND = 2.0       # pendulum action bound
TB_MAX = 8192     # max batch tile (columns per grid step)
LANE = 128


def _round_up(n, m):
    return ((n + m - 1) // m) * m


def _choose_tiling(batch):
    """Pick (TB, B_pad).  Prefer >=2 grid steps (v7x dual-TC) for larger batches."""
    b_lane = _round_up(batch, LANE)
    if b_lane <= LANE:
        tb = LANE
    else:
        tb = min(TB_MAX, _round_up((b_lane + 1) // 2, LANE))
    b_pad = _round_up(b_lane, tb)
    return tb, b_pad


def _actor_kernel(xT_ref, w1T_ref, b1_ref, whT_ref, bhT_ref, out_ref,
                  *, bound, n_states):
    xT = xT_ref[...]        # (n_states, TB)
    w1T = w1T_ref[...]      # (HIDDEN, n_states)

    # First layer (Linear(n_states, 128) + ReLU) as n_states VPU broadcast-FMAs.
    # K=3 would waste the MXU contraction depth; VPU keeps it lane-dense.
    h = b1_ref[...] + w1T[:, 0:1] * xT[0:1, :]          # (HIDDEN, TB)
    for k in range(1, n_states):
        h = h + w1T[:, k:k + 1] * xT[k:k + 1, :]
    h = jnp.maximum(h, 0.0)
    # (Reference applies F.relu a second time -- a no-op on a ReLU output.)

    # Fused heads: one (2, 128) x (128, TB) MXU matmul, lane-dense result.
    head = jnp.dot(whT_ref[...], h,
                   preferred_element_type=jnp.float32) + bhT_ref[...]  # (2, TB)

    # Row 0 -> mu = bound * tanh(.) ; row 1 -> sigma = softplus(.)
    mu_row = bound * jnp.tanh(head[0:1, :])
    z = head[1:2, :]
    sigma_row = jnp.maximum(z, 0.0) + jnp.log1p(jnp.exp(-jnp.abs(z)))

    out_ref[0:1, :] = mu_row
    out_ref[1:2, :] = sigma_row


def actor_net_forward(x, params, bound=BOUND):
    """x: (B, n_states) float32 -> (mu, sigma), each (B, 1) float32."""
    w1, b1, w2, b2, w3, b3 = params
    B, n_states = x.shape
    hidden = w1.shape[1]

    # Transposed, lane-dense parameter layouts (all tiny; stay resident in VMEM).
    w1T = w1.T                                      # (hidden, n_states)
    b1T = b1.T                                      # (hidden, 1)
    whT = jnp.concatenate([w2, w3], axis=1).T       # (2, hidden)
    bhT = jnp.concatenate([b2, b3], axis=1).T       # (2, 1)

    TB, B_pad = _choose_tiling(B)

    xT = x.T                                        # (n_states, B)
    if B_pad != B:
        xT = jnp.pad(xT, ((0, 0), (0, B_pad - B)))

    kernel = functools.partial(_actor_kernel, bound=float(bound),
                               n_states=n_states)

    out = pl.pallas_call(
        kernel,
        out_shape=jax.ShapeDtypeStruct((2, B_pad), jnp.float32),
        grid_spec=pltpu.PrefetchScalarGridSpec(
            num_scalar_prefetch=0,
            grid=(B_pad // TB,),
            in_specs=[
                pl.BlockSpec((n_states, TB), lambda i: (0, i)),     # x.T tile
                pl.BlockSpec((hidden, n_states), lambda i: (0, 0)),  # w1.T (resident)
                pl.BlockSpec((hidden, 1), lambda i: (0, 0)),         # b1.T (resident)
                pl.BlockSpec((2, hidden), lambda i: (0, 0)),         # fused head W.T
                pl.BlockSpec((2, 1), lambda i: (0, 0)),              # fused head b.T
            ],
            out_specs=pl.BlockSpec((2, TB), lambda i: (0, i)),       # lane-dense out
        ),
        compiler_params=pltpu.CompilerParams(
            dimension_semantics=("parallel",),
        ),
    )(xT, w1T, b1T, whT, bhT)

    mu = out[0, :B][:, None]
    sigma = out[1, :B][:, None]
    return mu, sigma


def init_params(key, n_states=N_STATES, hidden=HIDDEN):
    """Deterministic init mirroring PyTorch Linear default (U[-1/sqrt(fan_in), ...])."""
    ks = jax.random.split(key, 6)

    def lin(kw, kb, fan_in, fan_out):
        lim = 1.0 / jnp.sqrt(float(fan_in))
        w = jax.random.uniform(kw, (fan_in, fan_out), jnp.float32, -lim, lim)
        b = jax.random.uniform(kb, (1, fan_out), jnp.float32, -lim, lim)
        return w, b

    w1, b1 = lin(ks[0], ks[1], n_states, hidden)
    w2, b2 = lin(ks[2], ks[3], hidden, 1)
    w3, b3 = lin(ks[4], ks[5], hidden, 1)
    return (w1, b1, w2, b2, w3, b3)


def actor_net_reference(x, params, bound=BOUND):
    """Pure-JAX reference for correctness checking."""
    w1, b1, w2, b2, w3, b3 = params
    h = jax.nn.relu(x @ w1 + b1)
    h = jax.nn.relu(h)
    mu = bound * jnp.tanh(h @ w2 + b2)
    sigma = jax.nn.softplus(h @ w3 + b3)
    return mu, sigma


if __name__ == "__main__":
    key = jax.random.PRNGKey(0)
    k_param, k_x, k_x2 = jax.random.split(key, 3)

    params = init_params(k_param)

    # Small-batch case (B=8, single grid step, heavy padding).
    batch = 8
    x = jax.random.normal(k_x, (batch, N_STATES), jnp.float32)
    mu, sigma = actor_net_forward(x, params)
    jax.block_until_ready((mu, sigma))

    mu_ref, sigma_ref = actor_net_reference(x, params)
    assert mu.shape == (batch, 1) and sigma.shape == (batch, 1)
    assert jnp.allclose(mu, mu_ref, atol=1e-5, rtol=1e-5)
    assert jnp.allclose(sigma, sigma_ref, atol=1e-5, rtol=1e-5)

    # Larger case (B=1000 -> padded to 1024, TB=512, 2 "parallel" grid steps).
    batch2 = 1000
    x2 = jax.random.normal(k_x2, (batch2, N_STATES), jnp.float32)
    mu2, sigma2 = actor_net_forward(x2, params)
    jax.block_until_ready((mu2, sigma2))

    mu2_ref, sigma2_ref = actor_net_reference(x2, params)
    assert mu2.shape == (batch2, 1) and sigma2.shape == (batch2, 1)
    assert jnp.allclose(mu2, mu2_ref, atol=1e-5, rtol=1e-5)
    assert jnp.allclose(sigma2, sigma2_ref, atol=1e-5, rtol=1e-5)

    print("KERNEL_OK")
</pallas_src>

<mosaic_0001>
module attributes {stable_mosaic.version = 11 : i64} {
  func.func @_actor_kernel(%arg0: i32, %arg1: memref<3x128xf32, #tpu.memory_space<vmem>>, %arg2: memref<128x3xf32, #tpu.memory_space<vmem>>, %arg3: memref<128x1xf32, #tpu.memory_space<vmem>>, %arg4: memref<2x128xf32, #tpu.memory_space<vmem>>, %arg5: memref<2x1xf32, #tpu.memory_space<vmem>>, %arg6: memref<2x128xf32, #tpu.memory_space<vmem>>) attributes {dimension_semantics = [#tpu.dimension_semantics<parallel>], iteration_bounds = array<i64: 1>, scalar_prefetch = 0 : i64, scratch_operands = 0 : i64, tpu.core_type = #tpu.core_type<tc>, window_params = [{transform_indices = @transform_0, window_bounds = array<i64: 3, 128>}, {pipeline_mode = #tpu.pipeline_mode<synchronous>, transform_indices = @transform_1, window_bounds = array<i64: 128, 3>}, {pipeline_mode = #tpu.pipeline_mode<synchronous>, transform_indices = @transform_2, window_bounds = array<i64: 128, 1>}, {pipeline_mode = #tpu.pipeline_mode<synchronous>, transform_indices = @transform_3, window_bounds = array<i64: 2, 128>}, {pipeline_mode = #tpu.pipeline_mode<synchronous>, transform_indices = @transform_4, window_bounds = array<i64: 2, 1>}, {transform_indices = @transform_5, window_bounds = array<i64: 2, 128>}]} {
    %c0 = arith.constant 0 : index
    %c0_0 = arith.constant 0 : index
    %0 = vector.load %arg1[%c0, %c0_0] : memref<3x128xf32, #tpu.memory_space<vmem>>, vector<3x128xf32>
    %c0_1 = arith.constant 0 : index
    %c0_2 = arith.constant 0 : index
    %1 = vector.load %arg2[%c0_1, %c0_2] : memref<128x3xf32, #tpu.memory_space<vmem>>, vector<128x3xf32>
    %c0_3 = arith.constant 0 : index
    %c0_4 = arith.constant 0 : index
    %2 = vector.load %arg3[%c0_3, %c0_4] : memref<128x1xf32, #tpu.memory_space<vmem>>, vector<128x1xf32>
    %3 = vector.extract_strided_slice %1 {offsets = [0, 0], sizes = [128, 1], strides = [1, 1]} : vector<128x3xf32> to vector<128x1xf32>
    %4 = vector.extract_strided_slice %0 {offsets = [0, 0], sizes = [1, 128], strides = [1, 1]} : vector<3x128xf32> to vector<1x128xf32>
    %5 = vector.broadcast %3 : vector<128x1xf32> to vector<128x128xf32>
    %6 = vector.broadcast %4 : vector<1x128xf32> to vector<128x128xf32>
    %7 = arith.mulf %5, %6 : vector<128x128xf32>
    %8 = vector.broadcast %2 : vector<128x1xf32> to vector<128x128xf32>
    %9 = arith.addf %8, %7 : vector<128x128xf32>
    %10 = vector.extract_strided_slice %1 {offsets = [0, 1], sizes = [128, 1], strides = [1, 1]} : vector<128x3xf32> to vector<128x1xf32>
    %11 = vector.extract_strided_slice %0 {offsets = [1, 0], sizes = [1, 128], strides = [1, 1]} : vector<3x128xf32> to vector<1x128xf32>
    %12 = vector.broadcast %10 : vector<128x1xf32> to vector<128x128xf32>
    %13 = vector.broadcast %11 : vector<1x128xf32> to vector<128x128xf32>
    %14 = arith.mulf %12, %13 : vector<128x128xf32>
    %15 = arith.addf %9, %14 : vector<128x128xf32>
    %16 = vector.extract_strided_slice %1 {offsets = [0, 2], sizes = [128, 1], strides = [1, 1]} : vector<128x3xf32> to vector<128x1xf32>
    %17 = vector.extract_strided_slice %0 {offsets = [2, 0], sizes = [1, 128], strides = [1, 1]} : vector<3x128xf32> to vector<1x128xf32>
    %18 = vector.broadcast %16 : vector<128x1xf32> to vector<128x128xf32>
    %19 = vector.broadcast %17 : vector<1x128xf32> to vector<128x128xf32>
    %20 = arith.mulf %18, %19 : vector<128x128xf32>
    %21 = arith.addf %15, %20 : vector<128x128xf32>
    %cst = arith.constant 0.000000e+00 : f32
    %22 = vector.broadcast %cst : f32 to vector<128x128xf32>
    %23 = arith.maximumf %21, %22 : vector<128x128xf32>
    %c0_5 = arith.constant 0 : index
    %c0_6 = arith.constant 0 : index
    %24 = vector.load %arg4[%c0_5, %c0_6] : memref<2x128xf32, #tpu.memory_space<vmem>>, vector<2x128xf32>
    %cst_7 = arith.constant dense<0.000000e+00> : vector<2x128xf32>
    %25 = tpu.matmul %24, %23, %cst_7 {dimension_numbers = #tpu.dot_dimension_numbers<[1], [0], [0], [1], [0, 0, 1, 1], [], []>} : vector<2x128xf32>, vector<128x128xf32>, vector<2x128xf32> -> vector<2x128xf32>
    %c0_8 = arith.constant 0 : index
    %c0_9 = arith.constant 0 : index
    %26 = vector.load %arg5[%c0_8, %c0_9] : memref<2x1xf32, #tpu.memory_space<vmem>>, vector<2x1xf32>
    %27 = vector.broadcast %26 : vector<2x1xf32> to vector<2x128xf32>
    %28 = arith.addf %25, %27 : vector<2x128xf32>
    %29 = vector.extract_strided_slice %28 {offsets = [0, 0], sizes = [1, 128], strides = [1, 1]} : vector<2x128xf32> to vector<1x128xf32>
    %30 = math.tanh %29 : vector<1x128xf32>
    %cst_10 = arith.constant 2.000000e+00 : f32
    %31 = vector.broadcast %cst_10 : f32 to vector<1x128xf32>
    %32 = arith.mulf %31, %30 : vector<1x128xf32>
    %33 = vector.extract_strided_slice %28 {offsets = [1, 0], sizes = [1, 128], strides = [1, 1]} : vector<2x128xf32> to vector<1x128xf32>
    %cst_11 = arith.constant 0.000000e+00 : f32
    %34 = vector.broadcast %cst_11 : f32 to vector<1x128xf32>
    %35 = arith.maximumf %33, %34 : vector<1x128xf32>
    %36 = math.absf %33 : vector<1x128xf32>
    %cst_12 = arith.constant 0.000000e+00 : f32
    %37 = vector.broadcast %cst_12 : f32 to vector<1x128xf32>
    %38 = arith.subf %37, %36 : vector<1x128xf32>
    %39 = math.exp %38 : vector<1x128xf32>
    %40 = math.log1p %39 : vector<1x128xf32>
    %41 = arith.addf %35, %40 : vector<1x128xf32>
    %c0_13 = arith.constant 0 : index
    %c0_14 = arith.constant 0 : index
    %42 = vector.load %arg6[%c0_13, %c0_14] : memref<2x128xf32, #tpu.memory_space<vmem>>, vector<1x128xf32>
    tpu.vector_store %arg6[%c0_13, %c0_14], %32 {strides = array<i32>} : memref<2x128xf32, #tpu.memory_space<vmem>>, vector<1x128xf32>,
    %c1 = arith.constant 1 : index
    %c0_15 = arith.constant 0 : index
    %43 = vector.load %arg6[%c1, %c0_15] : memref<2x128xf32, #tpu.memory_space<vmem>>, vector<1x128xf32>
    tpu.vector_store %arg6[%c1, %c0_15], %41 {strides = array<i32>} : memref<2x128xf32, #tpu.memory_space<vmem>>, vector<1x128xf32>,
    return
  }
  func.func @transform_0(%arg0: i32) -> (i32, i32) {
    %c0_i32 = arith.constant 0 : i32
    %c0_i32_0 = arith.constant 0 : i32
    return %c0_i32, %arg0 : i32, i32
  }
  func.func @transform_1(%arg0: i32) -> (i32, i32) {
    %c0_i32 = arith.constant 0 : i32
    %c0_i32_0 = arith.constant 0 : i32
    %c0_i32_1 = arith.constant 0 : i32
    return %c0_i32, %c0_i32_0 : i32, i32
  }
  func.func @transform_2(%arg0: i32) -> (i32, i32) {
    %c0_i32 = arith.constant 0 : i32
    %c0_i32_0 = arith.constant 0 : i32
    %c0_i32_1 = arith.constant 0 : i32
    return %c0_i32, %c0_i32_0 : i32, i32
  }
  func.func @transform_3(%arg0: i32) -> (i32, i32) {
    %c0_i32 = arith.constant 0 : i32
    %c0_i32_0 = arith.constant 0 : i32
    %c0_i32_1 = arith.constant 0 : i32
    return %c0_i32, %c0_i32_0 : i32, i32
  }
  func.func @transform_4(%arg0: i32) -> (i32, i32) {
    %c0_i32 = arith.constant 0 : i32
    %c0_i32_0 = arith.constant 0 : i32
    %c0_i32_1 = arith.constant 0 : i32
    return %c0_i32, %c0_i32_0 : i32, i32
  }
  func.func @transform_5(%arg0: i32) -> (i32, i32) {
    %c0_i32 = arith.constant 0 : i32
    %c0_i32_0 = arith.constant 0 : i32
    return %c0_i32, %arg0 : i32, i32
  }
}

</mosaic_0001>

<bundles_post_ra>
// kernel: tpu_custom_call.1
= control target key start
LH: loop header
LB: loop body
LE: loop exit
PB: predicated region body
PF: predicated region fallthrough
CT: control target
= control target key end

     0   :  { %v725_v2 = vmov 0   ;;  %v726_v6 = vmov 1   ;;  %s1063_s0 = inlined_call_operand.vmem [shape: f32[3,128], index: 0, kind: input, shape index: {}]   ;;  %s1064_s1 = inlined_call_operand.vmem [shape: f32[128,3], index: 1, kind: input, shape index: {}]   ;;  %s1065_s2 = inlined_call_operand.vmem [shape: f32[128,1], index: 2, kind: input, shape index: {}]   ;;  %s1066_s3 = inlined_call_operand.vmem [shape: f32[2,128], index: 3, kind: input, shape index: {}]   ;;  %s1067_s4 = inlined_call_operand.vmem [shape: f32[2,1], index: 4, kind: input, shape index: {}]   ;;  %s1068_s5 = inlined_call_operand.hbm [shape: f32[2,128], index: 5, kind: output, shape index: {}]  }
   0x1   :  { %v38_v0 = vld [vmem:[%s1065_s2] sm:$0xff]  ;;  %660 = vset.pattern.permute.xlu1 %v725_v2  ;;  %659 = vset.pattern.permute.xlu0 %v725_v2  ;;  %v39_v3 = vld [vmem:[%s1065_s2 + $0x8] sm:$0xff]  ;;  %v25_v5 = vld [vmem:[%s1064_s1 + $0x18] sm:$0xff] }
   0x2   :  { %v768_v1 = vld [vmem:[%s1064_s1] sm:$0xff]  ;;  %156 = vperm.xlu1 %660, %v38_v0   ;;  %v23_v4 = vld [vmem:[%s1064_s1 + $0x8] sm:$0xff] }
   0x3   :  { %56 = vperm.xlu0 %659, %v768_v1  }
   0x6   :  { %161 = vperm.xlu1 %660, %v39_v3  }
   0x7   :  { %61 = vperm.xlu0 %659, %v23_v4  }
   0xa   :  { %661 = vset.pattern.permute.xlu1 %v726_v6 }
   0xb   :  { %71 = vperm.xlu0 %659, %v25_v5  }
   0xc   :  { %10 = vsyncpa [#allocation3], 0  ;;  %255 = vperm.xlu1 %661, %v23_v4   ;;  %v40_v7 = vld [vmem:[%s1065_s2 + $0x10] sm:$0xff]  ;;  %v27_v9 = vld [vmem:[%s1064_s1 + $0x28] sm:$0xff]  ;;  %v727_v11 = vmov 2   ;;  %v728_v27 = vmov 0.0|0.0   ;;  %v134_v57 = vlaneseq }
   0xd   :  { %v24_v8 = vld [vmem:[%s1064_s1 + $0x10] sm:$0xff]  ;;  %v42_v10 = vld [vmem:[%s1065_s2 + $0x20] sm:$0xff]  ;;  %v801_v12 = vld [vmem:[%s1064_s1 + $0x38] sm:$0xff]  ;;  %628 = vmatprep.subr.bf16.mxu0 %v728_v27  ;;  %vm729_vm0 = vmmov 0  }
   0xe   :  { %v41_v13 = vld [vmem:[%s1065_s2 + $0x18] sm:$0xff]  ;;  %v44_v14 = vld [vmem:[%s1065_s2 + $0x30] sm:$0xff]  ;;  %v814_v15 = vld [vmem:[%s1064_s1 + $0x48] sm:$0xff]  ;;  %v135_v60 = vshrl.u32 %v134_v57, 7 }
   0xf   :  { %166 = vperm.xlu0 %659, %v40_v7   ;;  %v46_v16 = vld [vmem:[%s1065_s2 + $0x40] sm:$0xff]  ;;  %v828_v18 = vld [vmem:[%s1064_s1 + $0x58] sm:$0xff]  ;;  %v48_v19 = vld [vmem:[%s1065_s2 + $0x50] sm:$0xff] }
  0x10   :  { %662 = vset.pattern.permute.xlu1 %v725_v2  ;;  %v26_v17 = vld [vmem:[%s1064_s1 + $0x20] sm:$0xff]  ;;  %v838_v20 = vld [vmem:[%s1064_s1 + $0x68] sm:$0xff]  ;;  %v851_v23 = vld [vmem:[%s1064_s1 + $0x78] sm:$0xff]  ;;  %v136_v62 = vsub.s32 0, %v135_v60  ;;  %v316_v3 = vsub.s32 1, %v135_v60  ;;  %v416_v7 = vsub.s32 2, %v135_v60 }
  0x11   :  { %66 = vperm.xlu1 %662, %v24_v8   ;;  %v43_v21 = vld [vmem:[%s1065_s2 + $0x28] sm:$0xff]  ;;  %v50_v22 = vld [vmem:[%s1065_s2 + $0x60] sm:$0xff]  ;;  %v52_v24 = vld [vmem:[%s1065_s2 + $0x70] sm:$0xff] }
  0x12   :  { %v28_v25 = vld [vmem:[%s1064_s1 + $0x30] sm:$0xff]  ;;  %v45_v26 = vld [vmem:[%s1065_s2 + $0x38] sm:$0xff]  ;;  %v30_v28 = vld [vmem:[%s1064_s1 + $0x40] sm:$0xff] }
  0x13   :  { %81 = vperm.xlu0 %659, %v27_v9   ;;  %v32_v29 = vld [vmem:[%s1064_s1 + $0x50] sm:$0xff]  ;;  %v34_v30 = vld [vmem:[%s1064_s1 + $0x60] sm:$0xff]  ;;  %v47_v32 = vld [vmem:[%s1065_s2 + $0x48] sm:$0xff] }
  0x14   :  { %v886_v31 = vld [vmem:[%s1064_s1 + $0x70] sm:$0xff]  ;;  %v49_v33 = vld [vmem:[%s1065_s2 + $0x58] sm:$0xff]  ;;  %v51_v43 = vld [vmem:[%s1065_s2 + $0x68] sm:$0xff] }
  0x15   :  { %663 = vset.pattern.permute.xlu1 %v727_v11  ;;  %v53_v55 = vld [vmem:[%s1065_s2 + $0x78] sm:$0xff] }
  0x16   :  { %351 = vperm.xlu1 %663, %v768_v1  }
  0x17   :  { %176 = vperm.xlu0 %659, %v42_v10  }
  0x1a   :  { %355 = vperm.xlu1 %663, %v23_v4  }
  0x1b   :  { %91 = vperm.xlu0 %659, %v801_v12  }
  0x1e   :  { %664 = vset.pattern.permute.xlu1 %v725_v2 }
  0x1f   :  { %171 = vperm.xlu1 %664, %v41_v13   ;;  %186 = vperm.xlu0 %659, %v44_v14  }
  0x23   :  { %665 = vset.pattern.permute.xlu1 %v726_v6  ;;  %101 = vperm.xlu0 %659, %v814_v15  }
  0x24   :  { %263 = vperm.xlu1 %665, %v25_v5  }
  0x27   :  { %196 = vperm.xlu0 %659, %v46_v16  }
  0x28   :  { %666 = vset.pattern.permute.xlu1 %v725_v2 }
  0x29   :  { %76 = vperm.xlu1 %666, %v26_v17  }
  0x2b   :  { %111 = vperm.xlu0 %659, %v828_v18  }
  0x2d   :  { %667 = vset.pattern.permute.xlu1 %v727_v11 }
  0x2e   :  { %359 = vperm.xlu1 %667, %v24_v8  }
  0x2f   :  { %206 = vperm.xlu0 %659, %v48_v19  }
  0x32   :  { %363 = vperm.xlu1 %667, %v25_v5  }
  0x33   :  { %121 = vperm.xlu0 %659, %v838_v20  }
  0x36   :  { %668 = vset.pattern.permute.xlu1 %v725_v2 }
  0x37   :  { %181 = vperm.xlu1 %668, %v43_v21   ;;  %216 = vperm.xlu0 %659, %v50_v22  }
  0x3b   :  { %669 = vset.pattern.permute.xlu1 %v726_v6  ;;  %131 = vperm.xlu0 %659, %v851_v23  }
  0x3c   :  { %271 = vperm.xlu1 %669, %v27_v9  }
  0x3f   :  { %226 = vperm.xlu0 %659, %v52_v24   ;;  %v467_v24 = vld [vmem:[%s1067_s4] sm:$0x3] }
  0x40   :  { %670 = vset.pattern.permute.xlu1 %v725_v2 }
  0x41   :  { %86 = vperm.xlu1 %670, %v28_v25  }
  0x43   :  { %688 = vset.pattern.permute.xlu0 %v726_v6 }
  0x44   :  { %251 = vperm.xlu0 %688, %v768_v1   ;;  %v21_v1 = vld [vmem:[%s1063_s0] sm:$0x7] }
  0x45   :  { %671 = vset.pattern.permute.xlu1 %v727_v11  ;;  %v962_v4 = vrot.slane %v21_v1, %v136_v62  ;;  %v973_v13 = vrot.slane %v21_v1, %v416_v7 }
  0x46   :  { %367 = vperm.xlu1 %671, %v26_v17  }
  0x48   :  { %259 = vperm.xlu0 %688, %v24_v8  }
  0x4a   :  { %371 = vperm.xlu1 %671, %v27_v9  }
  0x4c   :  { %267 = vperm.xlu0 %688, %v26_v17  }
  0x4e   :  { %672 = vset.pattern.permute.xlu1 %v725_v2 }
  0x4f   :  { %191 = vperm.xlu1 %672, %v45_v26  }
  0x50   :  { %275 = vperm.xlu0 %688, %v28_v25  }
  0x53   :  { %673 = vset.pattern.permute.xlu1 %v726_v6 }
  0x54   :  { %279 = vperm.xlu1 %673, %v801_v12   ;;  %283 = vperm.xlu0 %688, %v30_v28  }
  0x58   :  { %674 = vset.pattern.permute.xlu1 %v725_v2  ;;  %291 = vperm.xlu0 %688, %v32_v29  }
  0x59   :  { %96 = vperm.xlu1 %674, %v30_v28  }
  0x5c   :  { %299 = vperm.xlu0 %688, %v34_v30  }
  0x5d   :  { %675 = vset.pattern.permute.xlu1 %v727_v11 }
  0x5e   :  { %375 = vperm.xlu1 %675, %v28_v25  }
  0x60   :  { %307 = vperm.xlu0 %688, %v886_v31  }
  0x62   :  { %379 = vperm.xlu1 %675, %v801_v12  }
  0x64   :  { %692 = vset.pattern.permute.xlu0 %v727_v11 }
  0x65   :  { %411 = vperm.xlu0 %692, %v851_v23  }
  0x66   :  { %676 = vset.pattern.permute.xlu1 %v725_v2 }
  0x67   :  { %201 = vperm.xlu1 %676, %v47_v32  }
  0x69   :  { %694 = vset.pattern.permute.xlu0 %v725_v2 }
  0x6b   :  { %677 = vset.pattern.permute.xlu1 %v726_v6 }
  0x6c   :  { %287 = vperm.xlu1 %677, %v814_v15  }
  0x70   :  { %678 = vset.pattern.permute.xlu1 %v725_v2 }
  0x71   :  { %106 = vperm.xlu1 %678, %v32_v29  }
  0x75   :  { %679 = vset.pattern.permute.xlu1 %v727_v11 }
  0x76   :  { %383 = vperm.xlu1 %679, %v30_v28  }
  0x7a   :  { %387 = vperm.xlu1 %679, %v814_v15  }
  0x7e   :  { %680 = vset.pattern.permute.xlu1 %v725_v2 }
  0x7f   :  { %211 = vperm.xlu1 %680, %v49_v33  }
  0x81   :  { %v906_v34 = vpop.permute.xlu1 %156 }
  0x82   :  { %v908_v35 = vpop.permute.xlu0 %56 }
  0x83   :  { %681 = vset.pattern.permute.xlu1 %v726_v6 }
  0x84   :  { %295 = vperm.xlu1 %681, %v828_v18  }
  0x85   :  { %v162_v36 = vpop.permute.xlu1 %161 }
  0x86   :  { %v62_v37 = vpop.permute.xlu0 %61 }
  0x87   :  { %v139_v9 = vmul.f32 %v962_v4, %v62_v37 }
  0x88   :  { %682 = vset.pattern.permute.xlu1 %v725_v2 }
  0x89   :  { %116 = vperm.xlu1 %682, %v34_v30   ;;  %v235_v14 = vadd.f32 %v162_v36, %v139_v9 }
  0x8a   :  { %v72_v38 = vpop.permute.xlu0 %71 }
  0x8b   :  { %v256_v39 = vpop.permute.xlu1 %255  ;;  %v141_v16 = vmul.f32 %v962_v4, %v72_v38 }
  0x8d   :  { %683 = vset.pattern.permute.xlu1 %v727_v11 }
  0x8e   :  { %391 = vperm.xlu1 %683, %v32_v29   ;;  %v914_v40 = vpop.permute.xlu0 %166 }
  0x90   :  { %v916_v41 = vpop.permute.xlu1 %66 }
  0x91   :  { %v140_v22 = vmul.f32 %v962_v4, %v916_v41 }
  0x92   :  { %395 = vperm.xlu1 %683, %v828_v18   ;;  %v919_v42 = vpop.permute.xlu0 %81  ;;  %v730_v18 = vmov 0.0  }
  0x93   :  { %625 = vmatprep.mubr.msk.f32.mxu0 %vm729_vm0, %v730_v18  ;;  %v236_v36 = vadd.f32 %v914_v40, %v140_v22 }
  0x95   :  { %v924_v44 = vpop.permute.xlu1 %351 }
  0x96   :  { %684 = vset.pattern.permute.xlu1 %v725_v2  ;;  %v927_v45 = vpop.permute.xlu0 %176 }
  0x97   :  { %221 = vperm.xlu1 %684, %v51_v43  }
  0x99   :  { %v356_v46 = vpop.permute.xlu1 %355 }
  0x9a   :  { %v929_v47 = vpop.permute.xlu0 %91  ;;  %v419_v17 = vmul.f32 %v973_v13, %v356_v46 }
  0x9b   :  { %685 = vset.pattern.permute.xlu1 %v726_v6 }
  0x9c   :  { %303 = vperm.xlu1 %685, %v838_v20  }
  0x9e   :  { %v172_v48 = vpop.permute.xlu1 %171  ;;  %v933_v49 = vpop.permute.xlu0 %186 }
  0x9f   :  { %v237_v26 = vadd.f32 %v172_v48, %v141_v16 }
  0xa0   :  { %686 = vset.pattern.permute.xlu1 %v725_v2 }
  0xa1   :  { %126 = vperm.xlu1 %686, %v886_v31  }
  0xa2   :  { %v937_v50 = vpop.permute.xlu0 %101 }
  0xa3   :  { %v264_v51 = vpop.permute.xlu1 %263 }
  0xa5   :  { %687 = vset.pattern.permute.xlu1 %v727_v11 }
  0xa6   :  { %399 = vperm.xlu1 %687, %v34_v30   ;;  %v940_v52 = vpop.permute.xlu0 %196  ;;  %v143_v30 = vmul.f32 %v962_v4, %v919_v42 }
  0xa8   :  { %v77_v53 = vpop.permute.xlu1 %76 }
  0xaa   :  { %403 = vperm.xlu1 %687, %v838_v20   ;;  %v943_v54 = vpop.permute.xlu0 %111 }
  0xad   :  { %v360_v56 = vpop.permute.xlu1 %359 }
  0xae   :  { %689 = vset.pattern.permute.xlu1 %v725_v2  ;;  %v949_v58 = vpop.permute.xlu0 %206  ;;  %v420_v43 = vmul.f32 %v973_v13, %v360_v56 }
  0xaf   :  { %231 = vperm.xlu1 %689, %v53_v55  }
  0xb1   :  { %v364_v59 = vpop.permute.xlu1 %363 }
  0xb2   :  { %v951_v61 = vpop.permute.xlu0 %121  ;;  %v421_v28 = vmul.f32 %v973_v13, %v364_v59 }
  0xb3   :  { %690 = vset.pattern.permute.xlu1 %v726_v6  ;;  %v966_v6 = vrot.slane %v21_v1, %v316_v3 }
  0xb4   :  { %311 = vperm.xlu1 %690, %v851_v23  }
  0xb5   :  { %v319_v12 = vmul.f32 %v966_v6, %v256_v39 }
  0xb6   :  { %v182_v63 = vpop.permute.xlu1 %181  ;;  %v955_v0 = vpop.permute.xlu0 %216 }
  0xb7   :  { %v335_v19 = vadd.f32 %v319_v12, %v235_v14  ;;  %v239_v48 = vadd.f32 %v182_v63, %v143_v30 }
  0xb8   :  { %691 = vset.pattern.permute.xlu1 %v727_v11  ;;  %v138_v11 = vmul.f32 %v962_v4, %v908_v35 }
  0xb9   :  { %407 = vperm.xlu1 %691, %v886_v31   ;;  %v435_v25 = vadd.f32 %v419_v17, %v335_v19  ;;  %v418_v31 = vmul.f32 %v973_v13, %v924_v44 }
  0xba   :  { %v964_v5 = vpop.permute.xlu0 %131  ;;  %v234_v21 = vadd.f32 %v906_v34, %v138_v11  ;;  %v142_v34 = vmul.f32 %v962_v4, %v77_v53 }
  0xbb   :  { %v272_v8 = vpop.permute.xlu1 %271  ;;  %v451_v41 = vmax.f32 %v435_v25, 0.0 }
  0xbc   :  { %v323_v37 = vmul.f32 %v966_v6, %v272_v8  ;;  %v238_v53 = vadd.f32 %v927_v45, %v142_v34 }
  0xbd   :  { %693 = vset.pattern.permute.xlu1 %v725_v2  ;;  %v321_v2 = vmul.f32 %v966_v6, %v264_v51 }
  0xbe   :  { %v970_v10 = vpop.permute.xlu0 %226  ;;  %470 = vperm.xlu1 %693, %v467_v24   ;;  %v339_v59 = vadd.f32 %v323_v37, %v239_v48 }
  0xbf   :  { %v337_v33 = vadd.f32 %v321_v2, %v237_v26  ;;  %v145_v2 = vmul.f32 %v962_v4, %v929_v47 }
  0xc0   :  { %v87_v15 = vpop.permute.xlu1 %86 }
  0xc1   :  { %v437_v46 = vadd.f32 %v421_v28, %v337_v33  ;;  %v144_v19 = vmul.f32 %v962_v4, %v87_v15 }
  0xc3   :  { %v252_v20 = vpop.permute.xlu0 %251  ;;  %v453_v1 = vmax.f32 %v437_v46, 0.0  ;;  %v240_v22 = vadd.f32 %v933_v49, %v144_v19 }
  0xc4   :  { %v318_v23 = vmul.f32 %v966_v6, %v252_v20 }
  0xc5   :  { %v368_v29 = vpop.permute.xlu1 %367 }
  0xc6   :  { %v334_v32 = vadd.f32 %v318_v23, %v234_v21  ;;  %v422_v3 = vmul.f32 %v973_v13, %v368_v29 }
  0xc7   :  { %v260_v35 = vpop.permute.xlu0 %259 }
  0xc8   :  { %v320_v38 = vmul.f32 %v966_v6, %v260_v35  ;;  %v434_v39 = vadd.f32 %v418_v31, %v334_v32 }
  0xc9   :  { %v372_v42 = vpop.permute.xlu1 %371 }
  0xca   :  { %v336_v51 = vadd.f32 %v320_v38, %v236_v36  ;;  %v423_v44 = vmul.f32 %v973_v13, %v372_v42  ;;  %v450_v55 = vmax.f32 %v434_v39, 0.0 }
  0xcb   :  { %v268_v57 = vpop.permute.xlu0 %267 }
  0xcc   :  { %v436_v40 = vadd.f32 %v420_v43, %v336_v51  ;;  %v322_v60 = vmul.f32 %v966_v6, %v268_v57  ;;  %v629_v62 = vpack.c.bf16 %v451_v41, %v450_v55  ;;  %v439_v56 = vadd.f32 %v423_v44, %v339_v59 }
  0xcd   :  { %v147_v43 = vmul.f32 %v962_v4, %v937_v50 }
  0xce   :  { %v452_v7 = vmax.f32 %v436_v40, 0.0  ;;  %v338_v8 = vadd.f32 %v322_v60, %v238_v53  ;;  %v192_v9 = vpop.permute.xlu1 %191  ;;  %630 = vmatpush3.bf16.msra.mxu0 %v629_v62  ;;  %v455_v11 = vmax.f32 %v439_v56, 0.0 }
  0xcf   :  { %631 = vmatprep.subr.bf16.mxu0 %v728_v27  ;;  %v276_v18 = vpop.permute.xlu0 %275  ;;  %v241_v25 = vadd.f32 %v192_v9, %v145_v2 }
  0xd0   :  { %v438_v63 = vadd.f32 %v422_v3, %v338_v8  ;;  %v632_v12 = vpack.c.bf16 %v453_v1, %v452_v7  ;;  %v324_v20 = vmul.f32 %v966_v6, %v276_v18 }
  0xd2   :  { %v454_v45 = vmax.f32 %v438_v63, 0.0  ;;  %633 = vmatpush3.bf16.msra.mxu0 %v632_v12  ;;  %v340_v26 = vadd.f32 %v324_v20, %v240_v22  ;;  %v149_v63 = vmul.f32 %v962_v4, %v943_v54 }
  0xd3   :  { %v280_v14 = vpop.permute.xlu1 %279  ;;  %634 = vmatprep.subr.bf16.mxu0 %v728_v27  ;;  %v284_v37 = vpop.permute.xlu0 %283 }
  0xd4   :  { %v635_v16 = vpack.c.bf16 %v455_v11, %v454_v45  ;;  %v325_v23 = vmul.f32 %v966_v6, %v280_v14  ;;  %v326_v39 = vmul.f32 %v966_v6, %v284_v37 }
  0xd6   :  { %636 = vmatpush3.bf16.msra.mxu0 %v635_v16  ;;  %v341_v29 = vadd.f32 %v325_v23, %v241_v25 }
  0xd7   :  { %637 = vmatprep.subr.bf16.mxu0 %v728_v27  ;;  %v292_v7 = vpop.permute.xlu0 %291 }
  0xd8   :  { %v97_v17 = vpop.permute.xlu1 %96  ;;  %v328_v8 = vmul.f32 %v966_v6, %v292_v7 }
  0xd9   :  { %v146_v49 = vmul.f32 %v962_v4, %v97_v17 }
  0xdb   :  { %v242_v38 = vadd.f32 %v940_v52, %v146_v49  ;;  %v300_v25 = vpop.permute.xlu0 %299 }
  0xdd   :  { %v376_v21 = vpop.permute.xlu1 %375  ;;  %v342_v48 = vadd.f32 %v326_v39, %v242_v38 }
  0xde   :  { %v424_v24 = vmul.f32 %v973_v13, %v376_v21 }
  0xdf   :  { %v308_v37 = vpop.permute.xlu0 %307 }
  0xe0   :  { %v440_v30 = vadd.f32 %v424_v24, %v340_v26 }
  0xe1   :  { %v380_v28 = vpop.permute.xlu1 %379 }
  0xe2   :  { %v425_v31 = vmul.f32 %v973_v13, %v380_v28  ;;  %v456_v32 = vmax.f32 %v440_v30, 0.0  ;;  %v330_v28 = vmul.f32 %v966_v6, %v300_v25  ;;  %v151_v30 = vmul.f32 %v962_v4, %v951_v61 }
  0xe3   :  { %v153_v61 = vmul.f32 %v962_v4, %v964_v5 }
  0xe4   :  { %v441_v15 = vadd.f32 %v425_v31, %v341_v29 }
  0xe6   :  { %v457_v33 = vmax.f32 %v441_v15, 0.0  ;;  %v202_v47 = vpop.permute.xlu1 %201 }
  0xe7   :  { %v243_v51 = vadd.f32 %v202_v47, %v147_v43 }
  0xe8   :  { %v638_v34 = vpack.c.bf16 %v457_v33, %v456_v32 }
  0xea   :  { %639 = vmatpush3.bf16.msra.mxu0 %v638_v34 }
  0xeb   :  { %v288_v35 = vpop.permute.xlu1 %287  ;;  %640 = vmatprep.subr.bf16.mxu0 %v728_v27 }
  0xec   :  { %v327_v46 = vmul.f32 %v966_v6, %v288_v35 }
  0xee   :  { %v343_v55 = vadd.f32 %v327_v46, %v243_v51  ;;  %v412_v46 = vpop.permute.xlu0 %411 }
  0xf0   :  { %v107_v36 = vpop.permute.xlu1 %106 }
  0xf1   :  { %v148_v50 = vmul.f32 %v962_v4, %v107_v36 }
  0xf3   :  { %v244_v56 = vadd.f32 %v949_v58, %v148_v50 }
  0xf5   :  { %v384_v41 = vpop.permute.xlu1 %383  ;;  %v344_v45 = vadd.f32 %v328_v8, %v244_v56 }
  0xf6   :  { %v426_v42 = vmul.f32 %v973_v13, %v384_v41 }
  0xf8   :  { %v442_v53 = vadd.f32 %v426_v42, %v342_v48 }
  0xf9   :  { %v388_v44 = vpop.permute.xlu1 %387 }
  0xfa   :  { %v427_v57 = vmul.f32 %v973_v13, %v388_v44  ;;  %v458_v40 = vmax.f32 %v442_v53, 0.0 }
  0xfc   :  { %v443_v59 = vadd.f32 %v427_v57, %v343_v55  ;;  %v433_v55 = vmul.f32 %v973_v13, %v412_v46  ;;  %v332_v57 = vmul.f32 %v966_v6, %v308_v37 }
  0xfe   :  { %v459_v52 = vmax.f32 %v443_v59, 0.0  ;;  %v212_v60 = vpop.permute.xlu1 %211 }
  0xff   :  { %v245_v14 = vadd.f32 %v212_v60, %v149_v63 }
 0x100   :  { %v641_v62 = vpack.c.bf16 %v459_v52, %v458_v40 }
 0x102   :  { %642 = vmatpush3.bf16.msra.mxu0 %v641_v62 }
 0x103   :  { %v296_v1 = vpop.permute.xlu1 %295  ;;  %643 = vmatprep.subr.bf16.mxu0 %v728_v27 }
 0x104   :  { %v329_v12 = vmul.f32 %v966_v6, %v296_v1 }
 0x106   :  { %v345_v17 = vadd.f32 %v329_v12, %v245_v14 }
 0x108   :  { %v117_v3 = vpop.permute.xlu1 %116 }
 0x109   :  { %v150_v54 = vmul.f32 %v962_v4, %v117_v3 }
 0x10b   :  { %v246_v26 = vadd.f32 %v955_v0, %v150_v54 }
 0x10d   :  { %v392_v9 = vpop.permute.xlu1 %391  ;;  %v346_v32 = vadd.f32 %v330_v28, %v246_v26 }
 0x10e   :  { %v428_v11 = vmul.f32 %v973_v13, %v392_v9 }
 0x110   :  { %v444_v18 = vadd.f32 %v428_v11, %v344_v45 }
 0x111   :  { %v396_v16 = vpop.permute.xlu1 %395 }
 0x112   :  { %v429_v19 = vmul.f32 %v973_v13, %v396_v16  ;;  %v460_v20 = vmax.f32 %v444_v18, 0.0 }
 0x114   :  { %v445_v2 = vadd.f32 %v429_v19, %v345_v17 }
 0x116   :  { %v461_v58 = vmax.f32 %v445_v2, 0.0  ;;  %v222_v21 = vpop.permute.xlu1 %221 }
 0x117   :  { %v247_v33 = vadd.f32 %v222_v21, %v151_v30 }
 0x118   :  { %v644_v22 = vpack.c.bf16 %v461_v58, %v460_v20 }
 0x11a   :  { %645 = vmatpush3.bf16.msra.mxu0 %v644_v22 }
 0x11b   :  { %v304_v23 = vpop.permute.xlu1 %303  ;;  %646 = vmatprep.subr.bf16.mxu0 %v728_v27 }
 0x11c   :  { %v331_v31 = vmul.f32 %v966_v6, %v304_v23 }
 0x11e   :  { %v347_v34 = vadd.f32 %v331_v31, %v247_v33 }
 0x120   :  { %v127_v24 = vpop.permute.xlu1 %126 }
 0x121   :  { %v152_v43 = vmul.f32 %v962_v4, %v127_v24 }
 0x123   :  { %v248_v44 = vadd.f32 %v970_v10, %v152_v43 }
 0x125   :  { %v400_v29 = vpop.permute.xlu1 %399  ;;  %v348_v52 = vadd.f32 %v332_v57, %v248_v44 }
 0x126   :  { %v430_v15 = vmul.f32 %v973_v13, %v400_v29 }
 0x128   :  { %v446_v35 = vadd.f32 %v430_v15, %v346_v32 }
 0x129   :  { %v404_v47 = vpop.permute.xlu1 %403 }
 0x12a   :  { %v431_v49 = vmul.f32 %v973_v13, %v404_v47  ;;  %v462_v0 = vmax.f32 %v446_v35, 0.0 }
 0x12c   :  { %v447_v36 = vadd.f32 %v431_v49, %v347_v34 }
 0x12e   :  { %v463_v38 = vmax.f32 %v447_v36, 0.0  ;;  %v232_v39 = vpop.permute.xlu1 %231 }
 0x12f   :  { %v249_v48 = vadd.f32 %v232_v39, %v153_v61 }
 0x130   :  { %v647_v41 = vpack.c.bf16 %v463_v38, %v462_v0 }
 0x132   :  { %648 = vmatpush3.bf16.msra.mxu0 %v647_v41 }
 0x133   :  { %v312_v42 = vpop.permute.xlu1 %311  ;;  %649 = vmatprep.subr.bf16.mxu0 %v728_v27  ;;  %v466_v27 = vld [vmem:[%s1066_s3] sm:$0x3]  ;;  %s731_s3 = smov [#allocation2]  }
 0x134   :  { %v333_v51 = vmul.f32 %v966_v6, %v312_v42  ;;  %s568_s9 = sshll.u32 %s731_s3, 4  ;;  %s569_s9 = int_to_ptr.vmem [resolvable:$true] %s568_s9 }
 0x135   :  { %s701_s10 = scalar_lea.vmem %s569_s9, 32  ;;  %p706_p1 = scmp.lt.s32.totalorder %s569_s9, %s569_s9 }
 0x136   :  { %v349_v53 = vadd.f32 %v333_v51, %v249_v48  ;;  %p702_p0 = scmp.ne.s32.totalorder %s569_s9, %s701_s10  ;;  %p707_p2 = scmp.lt.s32.totalorder %s701_s10, %s701_s10 }
 0x138   :  { %v408_v59 = vpop.permute.xlu1 %407  ;;  %v449_v40 = vadd.f32 %v433_v55, %v349_v53  ;;  %p708_p3 = por %p707_p2, %p706_p1 }
 0x139   :  { %v432_v4 = vmul.f32 %v973_v13, %v408_v59 }
 0x13a   :  { %v465_v60 = vmax.f32 %v449_v40, 0.0  ;;  %p709_p4 = pnand %p708_p3, %p702_p0 }
 0x13b   :  { %v448_v5 = vadd.f32 %v432_v4, %v348_v52 }
 0x13d   :  { %v464_v62 = vmax.f32 %v448_v5, 0.0  ;;  %v471_v10 = vpop.permute.xlu1 %470 }
 0x13f   :  { %v650_v1 = vpack.c.bf16 %v465_v60, %v464_v62 }
 0x141   :  { %651 = vmatpush3.bf16.msra.mxu0 %v650_v1 }
 0x144   :  { %626 = vmatmul.mubr.f32.vlgmr.msra.gmra.mrb[0].mxu0 %v466_v27 }
 0x217   :  { %v539_v50 = vpop.f32.mrb[0].mxu0 }
 0x218   :  { %v540_v3 = vadd.f32 %v539_v50, %v471_v10  ;;  %v627_v7 = vpop.f32.mrb[1].mxu0 }
 0x21a   :  { %695 = vtanh.f32 %v540_v3  ;;  %v546_v6 = vand.u32 2147483647, %v540_v3  ;;  %v545_v19 = vmax.f32 %v540_v3, 0.0 }
 0x21c   :  { %v547_v56 = vsub.f32 0.0, %v546_v6 }
 0x21e   :  { %v548_v8 = vmul.f32 1.442695, %v547_v56 }
 0x220   :  { %697 = vpow2.f32 %v548_v8 }
 0x224   :  { %v696_v13 = vpop.eup %695 }
 0x225   :  { %v544_v9 = vmul.f32 2.0, %v696_v13 }
 0x227   :  { %560 = vst [vmem:[#allocation2] sm:$0x1] %v544_v9 }
 0x22a   :  { %v698_v63 = vpop.eup %697 }
 0x22b   :  { %v550_v12 = vadd.f32 1.0, %v698_v63  ;;  %v553_v11 = vmul.f32 -0.5, %v698_v63  ;;  %v556_v14 = vand.u32 2147483647, %v698_v63 }
 0x22d   :  { %699 = vlog2.f32 %v550_v12  ;;  %v554_v45 = vadd.f32 1.0, %v553_v11  ;;  %vm557_vm1 = vcmp.lt.f32.partialorder %v556_v14, 0.0004427343 }
 0x22f   :  { %v555_v18 = vmul.f32 %v698_v63, %v554_v45 }
 0x237   :  { %v700_v16 = vpop.eup %699 }
 0x238   :  { %v552_v17 = vmul.f32 0.6931472, %v700_v16 }
 0x23a   :  { %v558_v2 = vsel %vm557_vm1, %v555_v18, %v552_v17 }
 0x23b   :  { %v559_v20 = vadd.f32 %v558_v2, %v545_v19 }
 0x23d   :  { %561 = vst [vmem:[#allocation2] sm:$0x2] %v559_v20 }
 0x23e   :  { %712 = shalt.err (!%p709_p4)
}
 0x23f   :  { %s713_s13 = scalar_lea.hbm %s1068_s5, 32 }
 0x240   :  { %p714_p5 = scmp.ne.s32.totalorder %s1068_s5, %s713_s13  ;;  %p717_p6 = scmp.lt.u32.totalorder %s713_s13, %s1068_s5 }
 0x242   :  { %p719_p7 = pnand %p717_p6, %p714_p5 }
 0x244   :  { %722 = shalt.err (!%p719_p7)
}
 0x245   :  { %571 = dma.vmem_to_hbm [thread:$0]  %s569_s9, 32, %s1068_s5, [#allocation3]  }
 0x246   :  { %723 = dma.done.wait [#allocation3], 32  }
 0x247   :  { %724 = vsyncadd [#allocation3], 4294967264 }
 0x248   :  { %575 = vsyncpa [#allocation3], 1 }

</bundles_post_ra>
